<compile_context>
chip_gen: v5e
topology: v5e:2x2
jax: 0.10.0
libtpu: 0.0.40
codegen_flags: <defaults>
</compile_context>

<pallas_src>
import numpy as np
import jax
import jax.numpy as jnp
from jax.experimental import pallas as pl
from jax.experimental.pallas import tpu as pltpu


# ----------------------------- DFT matrices (trace-time constants) -----------------------------

def _idft_matrix(n, axis_left, center):
    """Complex inverse-DFT matrix (norm='ortho') for one axis; center=True bakes the module's
    exact IFFT2c convention: ifftshift(ifft(fftshift(x)))."""
    x = np.eye(n, dtype=np.complex64)
    ax = 0 if axis_left else 1
    if center:
        x = np.fft.fftshift(x, axes=ax)
    x = np.fft.ifft(x, axis=ax, norm="ortho")
    if center:
        x = np.fft.ifftshift(x, axes=ax)
    return x


def _dft_block_matrices(H, W, center, dtype=jnp.bfloat16):
    fh = _idft_matrix(H, axis_left=True, center=center)     # Y = Fh @ T   (H axis, left-multiply)
    fw = _idft_matrix(W, axis_left=False, center=center)    # T = X @ Fw   (W axis, right-multiply)
    gh = np.block([[fh.real, -fh.imag], [fh.imag, fh.real]]).astype(np.float32)   # (2H, 2H)
    gw = np.block([[fw.real, fw.imag], [-fw.imag, fw.real]]).astype(np.float32)   # (2W, 2W)
    return jnp.asarray(gh, dtype), jnp.asarray(gw, dtype)


# ------------------------------------------ kernel ---------------------------------------------

def _make_kernel(cb, h, w):
    def kernel(ks_ref, mk_ref, sm_ref, gw_ref, gh_ref, o_ref):
        # ks_ref: (CB, H, 2W) bf16 = [Xr | Xi];  mk_ref: (H, 2W) or (CB, H, 2W) bf16
        # sm_ref: (CB, 2, H, W) bf16;  gw_ref: (2W, 2W) bf16;  gh_ref: (2H, 2H) bf16
        # o_ref : (CB, 2, H) f32
        # mask in bf16 (exact for 0/1 masks); product stays bf16 = MXU operand dtype.
        xm = (ks_ref[...] * mk_ref[...]).reshape(cb * h, 2 * w)                  # (CB*H, 2W) bf16

        # IDFT along W for the whole coil block in one MXU matmul (Gw stationary, f32 accum).
        tc = jnp.dot(xm, gw_ref[...], preferred_element_type=jnp.float32)        # (CB*H, 2W) f32
        tcb = tc.astype(jnp.bfloat16)

        # restack [Tr | Ti] (column-packed) -> [Tr ; Ti] (row-packed), coil blocks side by side.
        cols = []
        for c in range(cb):
            blk = tcb[c * h:(c + 1) * h]                                          # (H, 2W)
            cols.append(jnp.concatenate([blk[:, :w], blk[:, w:]], axis=0))        # (2H, W)
        ts = jnp.concatenate(cols, axis=1) if cb > 1 else cols[0]                 # (2H, CB*W)

        # IDFT along H for all CB coils in one wide MXU matmul (N = CB*W, f32 accum).
        ys = jnp.dot(gh_ref[...], ts, preferred_element_type=jnp.float32)         # (2H, CB*W)

        # Z = Y * conj(S) in f32 on the VPU, then the adjoint reduction over dim=-1 (W).
        outs = []
        for c in range(cb):
            yr = ys[:h, c * w:(c + 1) * w]
            yi = ys[h:, c * w:(c + 1) * w]
            sr = sm_ref[c, 0].astype(jnp.float32)
            si = sm_ref[c, 1].astype(jnp.float32)
            zr = yr * sr + yi * si
            zi = yi * sr - yr * si
            outs.append(jnp.stack([jnp.sum(zr, axis=-1), jnp.sum(zi, axis=-1)], axis=0))  # (2, H)
        o_ref[...] = jnp.stack(outs, axis=0)                                       # (CB, 2, H)
    return kernel


# ----------------------------------------- wrapper ---------------------------------------------

def _pick_coils_per_step(C, H, W, budget_bytes=24 * 1024 * 1024, cap=8):
    """Largest divisor of C (<= cap) whose per-step working set fits a conservative VMEM budget
    (sized for v7x's 64 MiB physical VMEM; v5e/v6e have 128 MiB so this is always safe)."""
    best = 1
    for cb in range(1, min(C, cap) + 1):
        if C % cb:
            continue
        stream = 2 * (cb * H * 2 * W * 2        # kspace block (bf16), double-buffered
                      + cb * 2 * H * W * 2      # smaps block  (bf16), double-buffered
                      + cb * 2 * H * 4)         # output block (f32),  double-buffered
        const = ((2 * H) ** 2 + (2 * W) ** 2) * 2 + 2 * (H * 2 * W * 2)   # DFT mats + mask
        interm = (cb * H * 2 * W * 4            # tc (f32)
                  + cb * H * 2 * W * 2          # tc cast to bf16
                  + 2 * H * cb * W * 2          # ts (bf16)
                  + 2 * H * cb * W * 4          # ys (f32)
                  + 4 * H * W * 4)              # per-coil zr/zi temporaries (f32)
        if stream + const + interm <= budget_bytes:
            best = cb
    return best


def _const_spec(shape):
    """BlockSpec for a grid-invariant operand; single-buffer it when the JAX version allows."""
    n = len(shape)
    index_map = lambda b, j: (0,) * n
    if hasattr(pl, "Buffered"):
        try:
            return pl.BlockSpec(shape, index_map, pipeline_mode=pl.Buffered(1))
        except TypeError:       # older BlockSpec without pipeline_mode: default double-buffering
            pass
    return pl.BlockSpec(shape, index_map)


def _multicoil_adjoint(kspace, mask, smaps, center=False, coils_per_step=None):
    """Pallas TPU implementation of MulticoilAdjointOp.forward.

    kspace, smaps: complex64 [B, C, H, W]; mask: real, broadcastable to them.
    Returns complex64 [B, C, H, 1].
    """
    B, C, H, W = kspace.shape

    # ---- wrapper-side packing: everything streamed per (b, coil) is bf16 (halves HBM bytes) ----
    # k-space packed [Xr | Xi] along the last axis -> no in-kernel concat before matmul 1.
    ks = jnp.concatenate([jnp.real(kspace), jnp.imag(kspace)], axis=-1).astype(jnp.bfloat16)  # (B,C,H,2W)
    # smaps packed (B, C, 2, H, W): consumed only by VPU elementwise ops, sliced on a major axis.
    sm = jnp.stack([jnp.real(smaps), jnp.imag(smaps)], axis=2).astype(jnp.bfloat16)           # (B,C,2,H,W)

    # mask: keep un-broadcast over batch/coils in HBM; tile [M | M] once to match [Xr | Xi].
    mk = jnp.asarray(mask)
    if jnp.iscomplexobj(mk):
        mk = jnp.real(mk)
    mk = mk.astype(jnp.bfloat16)
    while mk.ndim < 4:
        mk = mk[None]
    Bm, Cm = mk.shape[0], mk.shape[1]
    assert Bm in (1, B) and Cm in (1, C), f"mask shape {mask.shape} not broadcastable to {kspace.shape}"
    mk = jnp.broadcast_to(mk, (Bm, Cm, H, W))      # only fills size-1 H/W dims; no B/C blow-up
    mk = jnp.concatenate([mk, mk], axis=-1)        # (Bm, Cm, H, 2W)

    cb = coils_per_step if coils_per_step is not None else _pick_coils_per_step(C, H, W)
    assert C % cb == 0, f"coils_per_step={cb} must divide C={C}"
    kernel = _make_kernel(cb, H, W)
    gh, gw = _dft_block_matrices(H, W, center)     # bf16 (2H,2H), (2W,2W) trace-time constants

    ks_spec = pl.BlockSpec((None, cb, H, 2 * W), lambda b, j: (b, j, 0, 0))
    sm_spec = pl.BlockSpec((None, cb, 2, H, W), lambda b, j: (b, j, 0, 0, 0))
    if Cm == C:   # per-coil mask (rare): stream the matching coil block
        mk_spec = pl.BlockSpec((None, cb, H, 2 * W),
                               (lambda b, j: (b, j, 0, 0)) if Bm == B else (lambda b, j: (0, j, 0, 0)))
    else:         # common case: one mask per batch (or one global mask), reused across coils
        mk_spec = pl.BlockSpec((None, None, H, 2 * W),
                               (lambda b, j: (b, 0, 0, 0)) if Bm == B else (lambda b, j: (0, 0, 0, 0)))
    out_spec = pl.BlockSpec((None, cb, 2, H), lambda b, j: (b, j, 0, 0))

    flops = int(B * C * (2 * H * (2 * W) * (2 * W)        # (CB*H,2W)@(2W,2W) per coil
                         + 2 * (2 * H) * (2 * H) * W      # (2H,2H)@(2H,CB*W) per coil
                         + 8 * H * W))                    # mask/smaps elementwise + reduce
    bytes_accessed = int(ks.size * 2 + sm.size * 2 + mk.size * 2
                         + (gh.size + gw.size) * 2 + B * C * 2 * H * 4)

    packed = pl.pallas_call(
        kernel,
        out_shape=jax.ShapeDtypeStruct((B, C, 2, H), jnp.float32),
        grid_spec=pltpu.PrefetchScalarGridSpec(
            num_scalar_prefetch=0,
            grid=(B, C // cb),
            in_specs=[ks_spec, mk_spec, sm_spec,
                      _const_spec((2 * W, 2 * W)), _const_spec((2 * H, 2 * H))],
            out_specs=out_spec),
        compiler_params=pltpu.CompilerParams(
            dimension_semantics=("parallel", "parallel"),
            vmem_limit_bytes=48 * 1024 * 1024),
        cost_estimate=pl.CostEstimate(flops=flops, transcendentals=0,
                                      bytes_accessed=bytes_accessed),
    )(ks, mk, sm, gw, gh)

    img = jax.lax.complex(packed[:, :, 0, :], packed[:, :, 1, :])   # (B, C, H) complex64
    return img[..., None]                                           # (B, C, H, 1)


multicoil_adjoint_op = jax.jit(_multicoil_adjoint,
                               static_argnames=("center", "coils_per_step"))


# ------------------------------------------- test ----------------------------------------------

if __name__ == "__main__":
    key = jax.random.PRNGKey(0)
    B, C, H, W = 2, 4, 16, 16
    k1, k2, k3, k4, k5 = jax.random.split(key, 5)

    kspace = jax.lax.complex(
        jax.random.normal(k1, (B, C, H, W), jnp.float32),
        jax.random.normal(k2, (B, C, H, W), jnp.float32))
    smaps = jax.lax.complex(
        jax.random.normal(k3, (B, C, H, W), jnp.float32),
        jax.random.normal(k4, (B, C, H, W), jnp.float32))
    mask = (jax.random.uniform(k5, (B, 1, H, W)) > 0.4).astype(jnp.float32)

    def reference(kspace, mask, smaps, center):
        # Pure-JAX mirror of the PyTorch forward for a [B, C, H, W] layout.
        masked = kspace * mask
        if center:
            x = jnp.fft.fftshift(masked, axes=(-2, -1))
            x = jnp.fft.ifft2(x, norm="ortho")
            coil = jnp.fft.ifftshift(x, axes=(-2, -1))
        else:
            coil = jnp.fft.ifft2(masked, norm="ortho")
        return jnp.sum(coil * jnp.conj(smaps), axis=-1)[..., None]

    for center in (False, True):
        out = jax.block_until_ready(multicoil_adjoint_op(kspace, mask, smaps, center=center))
        ref = reference(kspace, mask, smaps, center)
        assert out.shape == (B, C, H, 1) and out.dtype == jnp.complex64
        # bf16 streamed operands with f32 MXU accumulation: validate with a relative-L2 metric.
        rel = float(jnp.linalg.norm(out - ref) / jnp.linalg.norm(ref))
        assert rel < 2e-2, f"center={center}: relative L2 error {rel:.3e}"
    print("KERNEL_OK")
</pallas_src>

<mosaic_0001>
module attributes {stable_mosaic.version = 11 : i64} {
  func.func @kernel(%arg0: i32, %arg1: i32, %arg2: memref<1x4x16x32xbf16, #tpu.memory_space<vmem>>, %arg3: memref<1x1x16x32xbf16, #tpu.memory_space<vmem>>, %arg4: memref<1x4x2x16x16xbf16, #tpu.memory_space<vmem>>, %arg5: memref<32x32xbf16, #tpu.memory_space<vmem>>, %arg6: memref<32x32xbf16, #tpu.memory_space<vmem>>, %arg7: memref<1x4x2x16xf32, #tpu.memory_space<vmem>>) attributes {dimension_semantics = [#tpu.dimension_semantics<parallel>, #tpu.dimension_semantics<parallel>], iteration_bounds = array<i64: 2, 1>, scalar_prefetch = 0 : i64, scratch_operands = 0 : i64, tpu.core_type = #tpu.core_type<tc>, window_params = [{transform_indices = @transform_0, window_bounds = array<i64: 1, 4, 16, 32>}, {transform_indices = @transform_1, window_bounds = array<i64: 1, 1, 16, 32>}, {transform_indices = @transform_2, window_bounds = array<i64: 1, 4, 2, 16, 16>}, {pipeline_mode = #tpu.pipeline_mode<synchronous>, transform_indices = @transform_3, window_bounds = array<i64: 32, 32>}, {pipeline_mode = #tpu.pipeline_mode<synchronous>, transform_indices = @transform_4, window_bounds = array<i64: 32, 32>}, {transform_indices = @transform_5, window_bounds = array<i64: 1, 4, 2, 16>}]} {
    %c0 = arith.constant 0 : index
    %c0_0 = arith.constant 0 : index
    %c0_1 = arith.constant 0 : index
    %c0_2 = arith.constant 0 : index
    %0 = vector.load %arg2[%c0, %c0_0, %c0_1, %c0_2] : memref<1x4x16x32xbf16, #tpu.memory_space<vmem>>, vector<1x4x16x32xbf16>
    %1 = vector.shape_cast %0 : vector<1x4x16x32xbf16> to vector<4x16x32xbf16>
    %c0_3 = arith.constant 0 : index
    %c0_4 = arith.constant 0 : index
    %c0_5 = arith.constant 0 : index
    %c0_6 = arith.constant 0 : index
    %2 = vector.load %arg3[%c0_3, %c0_4, %c0_5, %c0_6] : memref<1x1x16x32xbf16, #tpu.memory_space<vmem>>, vector<1x1x16x32xbf16>
    %3 = vector.shape_cast %2 : vector<1x1x16x32xbf16> to vector<16x32xbf16>
    %4 = vector.shape_cast %3 : vector<16x32xbf16> to vector<1x16x32xbf16>
    %5 = vector.broadcast %4 : vector<1x16x32xbf16> to vector<4x16x32xbf16>
    %6 = arith.mulf %1, %5 : vector<4x16x32xbf16>
    %7 = vector.shape_cast %6 : vector<4x16x32xbf16> to vector<64x32xbf16>
    %c0_7 = arith.constant 0 : index
    %c0_8 = arith.constant 0 : index
    %8 = vector.load %arg5[%c0_7, %c0_8] : memref<32x32xbf16, #tpu.memory_space<vmem>>, vector<32x32xbf16>
    %cst = arith.constant dense<0.000000e+00> : vector<64x32xf32>
    %9 = tpu.matmul %7, %8, %cst {dimension_numbers = #tpu.dot_dimension_numbers<[1], [0], [0], [1], [0, 0, 1, 1], [], []>} : vector<64x32xbf16>, vector<32x32xbf16>, vector<64x32xf32> -> vector<64x32xf32>
    %10 = arith.truncf %9 : vector<64x32xf32> to vector<64x32xbf16>
    %11 = vector.extract_strided_slice %10 {offsets = [0, 0], sizes = [16, 32], strides = [1, 1]} : vector<64x32xbf16> to vector<16x32xbf16>
    %12 = vector.extract_strided_slice %11 {offsets = [0, 0], sizes = [16, 16], strides = [1, 1]} : vector<16x32xbf16> to vector<16x16xbf16>
    %13 = vector.extract_strided_slice %11 {offsets = [0, 16], sizes = [16, 16], strides = [1, 1]} : vector<16x32xbf16> to vector<16x16xbf16>
    %14 = tpu.concatenate %12, %13 in 0 : vector<16x16xbf16>, vector<16x16xbf16> -> vector<32x16xbf16>
    %15 = vector.extract_strided_slice %10 {offsets = [16, 0], sizes = [16, 32], strides = [1, 1]} : vector<64x32xbf16> to vector<16x32xbf16>
    %16 = vector.extract_strided_slice %15 {offsets = [0, 0], sizes = [16, 16], strides = [1, 1]} : vector<16x32xbf16> to vector<16x16xbf16>
    %17 = vector.extract_strided_slice %15 {offsets = [0, 16], sizes = [16, 16], strides = [1, 1]} : vector<16x32xbf16> to vector<16x16xbf16>
    %18 = tpu.concatenate %16, %17 in 0 : vector<16x16xbf16>, vector<16x16xbf16> -> vector<32x16xbf16>
    %19 = vector.extract_strided_slice %10 {offsets = [32, 0], sizes = [16, 32], strides = [1, 1]} : vector<64x32xbf16> to vector<16x32xbf16>
    %20 = vector.extract_strided_slice %19 {offsets = [0, 0], sizes = [16, 16], strides = [1, 1]} : vector<16x32xbf16> to vector<16x16xbf16>
    %21 = vector.extract_strided_slice %19 {offsets = [0, 16], sizes = [16, 16], strides = [1, 1]} : vector<16x32xbf16> to vector<16x16xbf16>
    %22 = tpu.concatenate %20, %21 in 0 : vector<16x16xbf16>, vector<16x16xbf16> -> vector<32x16xbf16>
    %23 = vector.extract_strided_slice %10 {offsets = [48, 0], sizes = [16, 32], strides = [1, 1]} : vector<64x32xbf16> to vector<16x32xbf16>
    %24 = vector.extract_strided_slice %23 {offsets = [0, 0], sizes = [16, 16], strides = [1, 1]} : vector<16x32xbf16> to vector<16x16xbf16>
    %25 = vector.extract_strided_slice %23 {offsets = [0, 16], sizes = [16, 16], strides = [1, 1]} : vector<16x32xbf16> to vector<16x16xbf16>
    %26 = tpu.concatenate %24, %25 in 0 : vector<16x16xbf16>, vector<16x16xbf16> -> vector<32x16xbf16>
    %27 = tpu.concatenate %14, %18, %22, %26 in 1 : vector<32x16xbf16>, vector<32x16xbf16>, vector<32x16xbf16>, vector<32x16xbf16> -> vector<32x64xbf16>
    %c0_9 = arith.constant 0 : index
    %c0_10 = arith.constant 0 : index
    %28 = vector.load %arg6[%c0_9, %c0_10] : memref<32x32xbf16, #tpu.memory_space<vmem>>, vector<32x32xbf16>
    %cst_11 = arith.constant dense<0.000000e+00> : vector<32x64xf32>
    %29 = tpu.matmul %28, %27, %cst_11 {dimension_numbers = #tpu.dot_dimension_numbers<[1], [0], [0], [1], [0, 0, 1, 1], [], []>} : vector<32x32xbf16>, vector<32x64xbf16>, vector<32x64xf32> -> vector<32x64xf32>
    %30 = vector.extract_strided_slice %29 {offsets = [0, 0], sizes = [16, 16], strides = [1, 1]} : vector<32x64xf32> to vector<16x16xf32>
    %31 = vector.extract_strided_slice %29 {offsets = [16, 0], sizes = [16, 16], strides = [1, 1]} : vector<32x64xf32> to vector<16x16xf32>
    %c0_12 = arith.constant 0 : index
    %c0_13 = arith.constant 0 : index
    %c0_14 = arith.constant 0 : index
    %c0_15 = arith.constant 0 : index
    %c0_16 = arith.constant 0 : index
    %32 = vector.load %arg4[%c0_12, %c0_13, %c0_14, %c0_15, %c0_16] : memref<1x4x2x16x16xbf16, #tpu.memory_space<vmem>>, vector<1x1x1x16x16xbf16>
    %33 = vector.shape_cast %32 : vector<1x1x1x16x16xbf16> to vector<16x16xbf16>
    %34 = arith.extf %33 : vector<16x16xbf16> to vector<16x16xf32>
    %c0_17 = arith.constant 0 : index
    %c0_18 = arith.constant 0 : index
    %c1 = arith.constant 1 : index
    %c0_19 = arith.constant 0 : index
    %c0_20 = arith.constant 0 : index
    %35 = vector.load %arg4[%c0_17, %c0_18, %c1, %c0_19, %c0_20] : memref<1x4x2x16x16xbf16, #tpu.memory_space<vmem>>, vector<1x1x1x16x16xbf16>
    %36 = vector.shape_cast %35 : vector<1x1x1x16x16xbf16> to vector<16x16xbf16>
    %37 = arith.extf %36 : vector<16x16xbf16> to vector<16x16xf32>
    %38 = arith.mulf %30, %34 : vector<16x16xf32>
    %39 = arith.mulf %31, %37 : vector<16x16xf32>
    %40 = arith.addf %38, %39 : vector<16x16xf32>
    %41 = arith.mulf %31, %34 : vector<16x16xf32>
    %42 = arith.mulf %30, %37 : vector<16x16xf32>
    %43 = arith.subf %41, %42 : vector<16x16xf32>
    %cst_21 = arith.constant dense<0.000000e+00> : vector<16xf32>
    %44 = vector.multi_reduction <add>, %40, %cst_21 [1] : vector<16x16xf32> to vector<16xf32>
    %cst_22 = arith.constant dense<0.000000e+00> : vector<16xf32>
    %45 = vector.multi_reduction <add>, %43, %cst_22 [1] : vector<16x16xf32> to vector<16xf32>
    %46 = vector.shape_cast %44 : vector<16xf32> to vector<1x16xf32>
    %47 = vector.shape_cast %45 : vector<16xf32> to vector<1x16xf32>
    %48 = tpu.concatenate %46, %47 in 0 : vector<1x16xf32>, vector<1x16xf32> -> vector<2x16xf32>
    %49 = vector.extract_strided_slice %29 {offsets = [0, 16], sizes = [16, 16], strides = [1, 1]} : vector<32x64xf32> to vector<16x16xf32>
    %50 = vector.extract_strided_slice %29 {offsets = [16, 16], sizes = [16, 16], strides = [1, 1]} : vector<32x64xf32> to vector<16x16xf32>
    %c0_23 = arith.constant 0 : index
    %c1_24 = arith.constant 1 : index
    %c0_25 = arith.constant 0 : index
    %c0_26 = arith.constant 0 : index
    %c0_27 = arith.constant 0 : index
    %51 = vector.load %arg4[%c0_23, %c1_24, %c0_25, %c0_26, %c0_27] : memref<1x4x2x16x16xbf16, #tpu.memory_space<vmem>>, vector<1x1x1x16x16xbf16>
    %52 = vector.shape_cast %51 : vector<1x1x1x16x16xbf16> to vector<16x16xbf16>
    %53 = arith.extf %52 : vector<16x16xbf16> to vector<16x16xf32>
    %c0_28 = arith.constant 0 : index
    %c1_29 = arith.constant 1 : index
    %c1_30 = arith.constant 1 : index
    %c0_31 = arith.constant 0 : index
    %c0_32 = arith.constant 0 : index
    %54 = vector.load %arg4[%c0_28, %c1_29, %c1_30, %c0_31, %c0_32] : memref<1x4x2x16x16xbf16, #tpu.memory_space<vmem>>, vector<1x1x1x16x16xbf16>
    %55 = vector.shape_cast %54 : vector<1x1x1x16x16xbf16> to vector<16x16xbf16>
    %56 = arith.extf %55 : vector<16x16xbf16> to vector<16x16xf32>
    %57 = arith.mulf %49, %53 : vector<16x16xf32>
    %58 = arith.mulf %50, %56 : vector<16x16xf32>
    %59 = arith.addf %57, %58 : vector<16x16xf32>
    %60 = arith.mulf %50, %53 : vector<16x16xf32>
    %61 = arith.mulf %49, %56 : vector<16x16xf32>
    %62 = arith.subf %60, %61 : vector<16x16xf32>
    %cst_33 = arith.constant dense<0.000000e+00> : vector<16xf32>
    %63 = vector.multi_reduction <add>, %59, %cst_33 [1] : vector<16x16xf32> to vector<16xf32>
    %cst_34 = arith.constant dense<0.000000e+00> : vector<16xf32>
    %64 = vector.multi_reduction <add>, %62, %cst_34 [1] : vector<16x16xf32> to vector<16xf32>
    %65 = vector.shape_cast %63 : vector<16xf32> to vector<1x16xf32>
    %66 = vector.shape_cast %64 : vector<16xf32> to vector<1x16xf32>
    %67 = tpu.concatenate %65, %66 in 0 : vector<1x16xf32>, vector<1x16xf32> -> vector<2x16xf32>
    %68 = vector.extract_strided_slice %29 {offsets = [0, 32], sizes = [16, 16], strides = [1, 1]} : vector<32x64xf32> to vector<16x16xf32>
    %69 = vector.extract_strided_slice %29 {offsets = [16, 32], sizes = [16, 16], strides = [1, 1]} : vector<32x64xf32> to vector<16x16xf32>
    %c0_35 = arith.constant 0 : index
    %c2 = arith.constant 2 : index
    %c0_36 = arith.constant 0 : index
    %c0_37 = arith.constant 0 : index
    %c0_38 = arith.constant 0 : index
    %70 = vector.load %arg4[%c0_35, %c2, %c0_36, %c0_37, %c0_38] : memref<1x4x2x16x16xbf16, #tpu.memory_space<vmem>>, vector<1x1x1x16x16xbf16>
    %71 = vector.shape_cast %70 : vector<1x1x1x16x16xbf16> to vector<16x16xbf16>
    %72 = arith.extf %71 : vector<16x16xbf16> to vector<16x16xf32>
    %c0_39 = arith.constant 0 : index
    %c2_40 = arith.constant 2 : index
    %c1_41 = arith.constant 1 : index
    %c0_42 = arith.constant 0 : index
    %c0_43 = arith.constant 0 : index
    %73 = vector.load %arg4[%c0_39, %c2_40, %c1_41, %c0_42, %c0_43] : memref<1x4x2x16x16xbf16, #tpu.memory_space<vmem>>, vector<1x1x1x16x16xbf16>
    %74 = vector.shape_cast %73 : vector<1x1x1x16x16xbf16> to vector<16x16xbf16>
    %75 = arith.extf %74 : vector<16x16xbf16> to vector<16x16xf32>
    %76 = arith.mulf %68, %72 : vector<16x16xf32>
    %77 = arith.mulf %69, %75 : vector<16x16xf32>
    %78 = arith.addf %76, %77 : vector<16x16xf32>
    %79 = arith.mulf %69, %72 : vector<16x16xf32>
    %80 = arith.mulf %68, %75 : vector<16x16xf32>
    %81 = arith.subf %79, %80 : vector<16x16xf32>
    %cst_44 = arith.constant dense<0.000000e+00> : vector<16xf32>
    %82 = vector.multi_reduction <add>, %78, %cst_44 [1] : vector<16x16xf32> to vector<16xf32>
    %cst_45 = arith.constant dense<0.000000e+00> : vector<16xf32>
    %83 = vector.multi_reduction <add>, %81, %cst_45 [1] : vector<16x16xf32> to vector<16xf32>
    %84 = vector.shape_cast %82 : vector<16xf32> to vector<1x16xf32>
    %85 = vector.shape_cast %83 : vector<16xf32> to vector<1x16xf32>
    %86 = tpu.concatenate %84, %85 in 0 : vector<1x16xf32>, vector<1x16xf32> -> vector<2x16xf32>
    %87 = vector.extract_strided_slice %29 {offsets = [0, 48], sizes = [16, 16], strides = [1, 1]} : vector<32x64xf32> to vector<16x16xf32>
    %88 = vector.extract_strided_slice %29 {offsets = [16, 48], sizes = [16, 16], strides = [1, 1]} : vector<32x64xf32> to vector<16x16xf32>
    %c0_46 = arith.constant 0 : index
    %c3 = arith.constant 3 : index
    %c0_47 = arith.constant 0 : index
    %c0_48 = arith.constant 0 : index
    %c0_49 = arith.constant 0 : index
    %89 = vector.load %arg4[%c0_46, %c3, %c0_47, %c0_48, %c0_49] : memref<1x4x2x16x16xbf16, #tpu.memory_space<vmem>>, vector<1x1x1x16x16xbf16>
    %90 = vector.shape_cast %89 : vector<1x1x1x16x16xbf16> to vector<16x16xbf16>
    %91 = arith.extf %90 : vector<16x16xbf16> to vector<16x16xf32>
    %c0_50 = arith.constant 0 : index
    %c3_51 = arith.constant 3 : index
    %c1_52 = arith.constant 1 : index
    %c0_53 = arith.constant 0 : index
    %c0_54 = arith.constant 0 : index
    %92 = vector.load %arg4[%c0_50, %c3_51, %c1_52, %c0_53, %c0_54] : memref<1x4x2x16x16xbf16, #tpu.memory_space<vmem>>, vector<1x1x1x16x16xbf16>
    %93 = vector.shape_cast %92 : vector<1x1x1x16x16xbf16> to vector<16x16xbf16>
    %94 = arith.extf %93 : vector<16x16xbf16> to vector<16x16xf32>
    %95 = arith.mulf %87, %91 : vector<16x16xf32>
    %96 = arith.mulf %88, %94 : vector<16x16xf32>
    %97 = arith.addf %95, %96 : vector<16x16xf32>
    %98 = arith.mulf %88, %91 : vector<16x16xf32>
    %99 = arith.mulf %87, %94 : vector<16x16xf32>
    %100 = arith.subf %98, %99 : vector<16x16xf32>
    %cst_55 = arith.constant dense<0.000000e+00> : vector<16xf32>
    %101 = vector.multi_reduction <add>, %97, %cst_55 [1] : vector<16x16xf32> to vector<16xf32>
    %cst_56 = arith.constant dense<0.000000e+00> : vector<16xf32>
    %102 = vector.multi_reduction <add>, %100, %cst_56 [1] : vector<16x16xf32> to vector<16xf32>
    %103 = vector.shape_cast %101 : vector<16xf32> to vector<1x16xf32>
    %104 = vector.shape_cast %102 : vector<16xf32> to vector<1x16xf32>
    %105 = tpu.concatenate %103, %104 in 0 : vector<1x16xf32>, vector<1x16xf32> -> vector<2x16xf32>
    %106 = vector.shape_cast %48 : vector<2x16xf32> to vector<1x2x16xf32>
    %107 = vector.shape_cast %67 : vector<2x16xf32> to vector<1x2x16xf32>
    %108 = vector.shape_cast %86 : vector<2x16xf32> to vector<1x2x16xf32>
    %109 = vector.shape_cast %105 : vector<2x16xf32> to vector<1x2x16xf32>
    %110 = tpu.concatenate %106, %107, %108, %109 in 0 : vector<1x2x16xf32>, vector<1x2x16xf32>, vector<1x2x16xf32>, vector<1x2x16xf32> -> vector<4x2x16xf32>
    %c0_57 = arith.constant 0 : index
    %c0_58 = arith.constant 0 : index
    %c0_59 = arith.constant 0 : index
    %c0_60 = arith.constant 0 : index
    %111 = vector.load %arg7[%c0_57, %c0_58, %c0_59, %c0_60] : memref<1x4x2x16xf32, #tpu.memory_space<vmem>>, vector<1x4x2x16xf32>
    %112 = vector.shape_cast %111 : vector<1x4x2x16xf32> to vector<4x2x16xf32>
    %113 = vector.shape_cast %110 : vector<4x2x16xf32> to vector<1x4x2x16xf32>
    tpu.vector_store %arg7[%c0_57, %c0_58, %c0_59, %c0_60], %113 {strides = array<i32>} : memref<1x4x2x16xf32, #tpu.memory_space<vmem>>, vector<1x4x2x16xf32>,
    return
  }
  func.func @transform_0(%arg0: i32, %arg1: i32) -> (i32, i32, i32, i32) {
    %c0_i32 = arith.constant 0 : i32
    %c0_i32_0 = arith.constant 0 : i32
    %c0_i32_1 = arith.constant 0 : i32
    return %arg0, %arg1, %c0_i32, %c0_i32_0 : i32, i32, i32, i32
  }
  func.func @transform_1(%arg0: i32, %arg1: i32) -> (i32, i32, i32, i32) {
    %c0_i32 = arith.constant 0 : i32
    %c0_i32_0 = arith.constant 0 : i32
    %c0_i32_1 = arith.constant 0 : i32
    %c0_i32_2 = arith.constant 0 : i32
    return %arg0, %c0_i32, %c0_i32_0, %c0_i32_1 : i32, i32, i32, i32
  }
  func.func @transform_2(%arg0: i32, %arg1: i32) -> (i32, i32, i32, i32, i32) {
    %c0_i32 = arith.constant 0 : i32
    %c0_i32_0 = arith.constant 0 : i32
    %c0_i32_1 = arith.constant 0 : i32
    %c0_i32_2 = arith.constant 0 : i32
    return %arg0, %arg1, %c0_i32, %c0_i32_0, %c0_i32_1 : i32, i32, i32, i32, i32
  }
  func.func @transform_3(%arg0: i32, %arg1: i32) -> (i32, i32) {
    %c0_i32 = arith.constant 0 : i32
    %c0_i32_0 = arith.constant 0 : i32
    %c0_i32_1 = arith.constant 0 : i32
    return %c0_i32, %c0_i32_0 : i32, i32
  }
  func.func @transform_4(%arg0: i32, %arg1: i32) -> (i32, i32) {
    %c0_i32 = arith.constant 0 : i32
    %c0_i32_0 = arith.constant 0 : i32
    %c0_i32_1 = arith.constant 0 : i32
    return %c0_i32, %c0_i32_0 : i32, i32
  }
  func.func @transform_5(%arg0: i32, %arg1: i32) -> (i32, i32, i32, i32) {
    %c0_i32 = arith.constant 0 : i32
    %c0_i32_0 = arith.constant 0 : i32
    %c0_i32_1 = arith.constant 0 : i32
    return %arg0, %arg1, %c0_i32, %c0_i32_0 : i32, i32, i32, i32
  }
}

</mosaic_0001>

<bundles_post_ra>
// kernel: custom-call.1
= control target key start
LH: loop header
LB: loop body
LE: loop exit
PB: predicated region body
PF: predicated region fallthrough
CT: control target
= control target key end

     0   :  { %s56_s0 = inlined_call_operand.hbm [shape: c64[2,4,16,16], index: 0, kind: input, shape index: {}]   ;;  %s57_s1 = inlined_call_operand.vmem [shape: f32[2,4,16,16], index: 1, kind: output, shape index: {}]  }
   0x1   :  { %s2_s8 = scalar_lea.hbm %s56_s0, 128 }
   0x2   :  { %3 = vsyncpa [#allocation0], 0  ;;  %s5_s9 = sshll.u32 %s2_s8, 4  ;;  %s7_s12 = sshll.u32 %s57_s1, 4  ;;  %s6_s9 = int_to_ptr.hbm [resolvable:$true] %s5_s9  ;;  %s8_s12 = int_to_ptr.vmem [resolvable:$true] %s7_s12 }
   0x3   :  { %10 = dma.hbm_to_vmem [thread:$0]  %s6_s9, 2048, %s8_s12, [#allocation0] }
   0x4   :  { %38 = dma.done.wait [#allocation0], 2048  }
   0x5   :  { %39 = vsyncadd [#allocation0], 4294965248 }
   0x6   :  { %13 = vsyncpa [#allocation0], 1 }

// kernel: custom-call
= control target key start
LH: loop header
LB: loop body
LE: loop exit
PB: predicated region body
PF: predicated region fallthrough
CT: control target
= control target key end

     0   :  { %2 = vsyncpa [#allocation0], 0  ;;  %s55_s0 = inlined_call_operand.hbm [shape: c64[2,4,16,16], index: 0, kind: input, shape index: {}]   ;;  %s56_s1 = inlined_call_operand.vmem [shape: f32[2,4,16,16], index: 1, kind: output, shape index: {}]  }
   0x1   :  { %s4_s8 = sshll.u32 %s55_s0, 4  ;;  %s6_s11 = sshll.u32 %s56_s1, 4  ;;  %s5_s8 = int_to_ptr.hbm [resolvable:$true] %s4_s8  ;;  %s7_s11 = int_to_ptr.vmem [resolvable:$true] %s6_s11 }
   0x2   :  { %9 = dma.hbm_to_vmem [thread:$0]  %s5_s8, 2048, %s7_s11, [#allocation0] }
   0x3   :  { %37 = dma.done.wait [#allocation0], 2048  }
   0x4   :  { %38 = vsyncadd [#allocation0], 4294965248 }
   0x5   :  { %12 = vsyncpa [#allocation0], 1 }

// kernel: custom-call.4
= control target key start
LH: loop header
LB: loop body
LE: loop exit
PB: predicated region body
PF: predicated region fallthrough
CT: control target
= control target key end

     0   :  { %s105_s0 = inlined_call_operand.vmem [shape: f32[2,4,16,1], index: 0, kind: input, shape index: {}]   ;;  %s106_s1 = inlined_call_operand.vmem [shape: f32[2,4,16,1], index: 1, kind: input, shape index: {}]   ;;  %s107_s2 = inlined_call_operand.hbm [shape: c64[2,4,16,1], index: 2, kind: output, shape index: {}]  }
   0x1   :  { %s3_s11 = scalar_lea.hbm %s107_s2, 8 }
   0x2   :  { %4 = vsyncpa [#allocation0], 0  ;;  %s6_s14 = sshll.u32 %s105_s0, 4  ;;  %s8_s17 = sshll.u32 %s107_s2, 4  ;;  %s7_s14 = int_to_ptr.vmem [resolvable:$true] %s6_s14  ;;  %s9_s17 = int_to_ptr.hbm [resolvable:$true] %s8_s17 }
   0x3   :  { %11 = dma.vmem_to_hbm [thread:$0]  %s7_s14, 128, %s9_s17, [#allocation0] }
   0x4   :  { %74 = dma.done.wait [#allocation0], 128  }
   0x5   :  { %75 = vsyncadd [#allocation0], 4294967168 }
   0x6   :  { %14 = vsyncpa [#allocation0], 1 }
   0x7   :  { %15 = vsyncpa [#allocation1], 0  ;;  %s17_s20 = sshll.u32 %s106_s1, 4  ;;  %s19_s21 = sshll.u32 %s3_s11, 4  ;;  %s18_s20 = int_to_ptr.vmem [resolvable:$true] %s17_s20  ;;  %s20_s21 = int_to_ptr.hbm [resolvable:$true] %s19_s21 }
   0x8   :  { %22 = dma.vmem_to_hbm [thread:$0]  %s18_s20, 128, %s20_s21, [#allocation1] }
   0x9   :  { %76 = dma.done.wait [#allocation1], 128  }
   0xa   :  { %77 = vsyncadd [#allocation1], 4294967168 }
   0xb   :  { %25 = vsyncpa [#allocation1], 1 }

// kernel: _multicoil_adjoint.1
= control target key start
LH: loop header
LB: loop body
LE: loop exit
PB: predicated region body
PF: predicated region fallthrough
CT: control target
= control target key end

     0   :  { %s1207_s18 = smov 0   ;;  %s1209_s19 = smov 0   ;;  %s1411_s0 = inlined_call_operand.vmem [shape: bf16[2,4,16,32], index: 0, kind: input, shape index: {}]   ;;  %s1412_s1 = inlined_call_operand.vmem [shape: bf16[2,1,16,32], index: 1, kind: input, shape index: {}]   ;;  %s1413_s2 = inlined_call_operand.vmem [shape: bf16[2,4,2,16,16], index: 2, kind: input, shape index: {}]   ;;  %s1414_s3 = inlined_call_operand.vmem [shape: bf16[32,32], index: 3, kind: input, shape index: {}]   ;;  %s1415_s4 = inlined_call_operand.vmem [shape: bf16[32,32], index: 4, kind: input, shape index: {}]   ;;  %s1416_s5 = inlined_call_operand.vmem [shape: f32[2,4,2,16], index: 5, kind: output, shape index: {}]  }
   0x1   :  { %s1211_s20 = smov 0  }
   0x2 LB: > { %s27_s21 = sadd.s32 1, %s1165_s19  ;;  %p966_p0 = scmp.ge.s32.totalorder %s1169_s20, 1  ;;  %s1169_s20 = sphi %s1211_s20, %s15_s20   ;;  %s1165_s19 = sphi %s1209_s19, %s1418_s19   ;;  %s1161_s18 = sphi %s1207_s18, %s1417_s18  }
   0x3   : > { %p29_p1 = scmp.ge.s32.totalorder %s27_s21, 2  ;;  %p237_p2 = scmp.lt.s32.totalorder %s1169_s20, 3 }
   0x5   : > { %s1420_s21 = smov (%p29_p1, %s27_s21), 0  ;;  %p238_p3 = pnand %p966_p0, %p237_p2 }
   0x6   : > { %p290_p4 = scmp.lt.s32.totalorder (!%p238_p3), %s1161_s18, 1  ;;  %s1171_s9 = smov (!%p238_p3), 112  }
   0x7   : > { %241 = sbr.rel (%p238_p3) target bundleno = 897 (0x381), region = 40  ;;  %s1172_s10 = smov (!%p238_p3), 16  }
   0x8   : > { %s1173_s11 = smov (!%p238_p3), 48   ;;  %s1174_s12 = smov (!%p238_p3), 32  }
   0x9   : > { %s1175_s25 = smov (!%p238_p3), 96  }
   0xc   : > { %v1018_v0 = vld [vmem:[%s1414_s3 + $0x8] sm:$0xff]  ;;  %v1017_v1 = vld [vmem:[%s1414_s3] sm:$0xff]  ;;  %s1422_s18 = smov (!%p290_p4, %s1161_s18), 1  ;;  %vm399_vm0 = vcmask 261120   ;;  %vm489_vm1 = vcmask 130048   ;;  %vm500_vm2 = vcmask 392192  }
   0xd   : > { %1083 = vmatpush.bf16.msra.mxu2 %v1018_v0  ;;  %1084 = vmatpush.bf16.msra.mxu3 %v1018_v0  ;;  %s1013_s26 = sshll.u32 %s1422_s18, 5  ;;  %s1014_s27 = sshll.u32 %s1422_s18, 3  ;;  %vm586_vm3 = vcmask 130112   ;;  %vm595_vm4 = vcmask 1040384   ;;  %vm834_vm5 = vcmask 123904  }
   0xe   : > { %418 = vmatpush.bf16.msra.mxu0 %v1018_v0  ;;  %s298_s30 = scalar_lea.vmem %s1411_s0, %s1013_s26  ;;  %s304_s8 = scalar_lea.vmem %s1412_s1, %s1014_s27 }
   0xf   : > { %v1073_v2 = vld [vmem:[%s298_s30 + $0x8] sm:$0xff]   ;;  %v1038_v3 = vld [vmem:[%s304_s8] sm:$0xff]   ;;  %v1075_v4 = vld [vmem:[%s298_s30 + $0x18] sm:$0xff]   ;;  %s1015_s13 = sshll.u32 %s1422_s18, 6  ;;  %s1176_s26 = smov 80  }
  0x10   : > { %v1027_v5 = vunpack.c.l.bf16 %v1073_v2  ;;  %v1028_v6 = vunpack.c.h.bf16 %v1073_v2  ;;  %v1039_v7 = vunpack.c.l.bf16 %v1038_v3  ;;  %v1040_v8 = vunpack.c.h.bf16 %v1038_v3  ;;  %v1022_v9 = vld [vmem:[%s298_s30] sm:$0xff]   ;;  %v1074_v20 = vld [vmem:[%s298_s30 + $0x10] sm:$0xff]   ;;  %s1264_s16 = scalar_lea.vmem %s1413_s2, %s1015_s13  ;;  %s1362_s30 = scalar_lea.vmem %s1416_s5, %s1014_s27 }
  0x11   : > { %1085 = vmatpush.bf16.msra.mxu2 %v1017_v1  ;;  %1086 = vmatpush.bf16.msra.mxu3 %v1017_v1  ;;  %v1035_v10 = vunpack.c.l.bf16 %v1075_v4  ;;  %v1036_v11 = vunpack.c.h.bf16 %v1075_v4  ;;  %v1023_v12 = vunpack.c.l.bf16 %v1022_v9  ;;  %v1024_v13 = vunpack.c.h.bf16 %v1022_v9 }
  0x12   : > { %419 = vmatpush.bf16.msra.mxu0 %v1017_v1  ;;  %v349_v14 = vmul.f32 %v1039_v7, %v1027_v5  ;;  %v350_v15 = vmul.f32 %v1040_v8, %v1028_v6  ;;  %v1031_v29 = vunpack.c.l.bf16 %v1074_v20  ;;  %v1032_v30 = vunpack.c.h.bf16 %v1074_v20 }
  0x13   : > { %v353_v16 = vmul.f32 %v1039_v7, %v1035_v10  ;;  %v354_v17 = vmul.f32 %v1040_v8, %v1036_v11  ;;  %v347_v18 = vmul.f32 %v1039_v7, %v1023_v12  ;;  %v348_v19 = vmul.f32 %v1040_v8, %v1024_v13  ;;  %v1077_v12 = vld [vmem:[%s1264_s16 + $0x10] sm:$0xff]  }
  0x14   : > { %v357_v21 = vpack.c.bf16 %v349_v14, %v349_v14  ;;  %v358_v22 = vpack.c.bf16 %v350_v15, %v350_v15  ;;  %v351_v38 = vmul.f32 %v1039_v7, %v1031_v29  ;;  %v352_v39 = vmul.f32 %v1040_v8, %v1032_v30 }
  0x15   : > { %v361_v23 = vpack.c.bf16 %v353_v16, %v353_v16  ;;  %v362_v24 = vpack.c.bf16 %v354_v17, %v354_v17  ;;  %v355_v25 = vpack.c.bf16 %v347_v18, %v347_v18  ;;  %v356_v26 = vpack.c.bf16 %v348_v19, %v348_v19  ;;  %v1080_v16 = vld [vmem:[%s1264_s16 + $0x28] sm:$0xff]   ;;  %v1081_v17 = vld [vmem:[%s1264_s16 + $0x30] sm:$0xff]  }
  0x16   : > { %v377_v27 = vunpack.c.l.b16 %v357_v21  ;;  %v378_v28 = vunpack.c.l.b16 %v358_v22  ;;  %v359_v40 = vpack.c.bf16 %v351_v38, %v351_v38  ;;  %v360_v41 = vpack.c.bf16 %v352_v39, %v352_v39  ;;  %v1082_v39 = vld [vmem:[%s1264_s16 + $0x38] sm:$0xff]  }
  0x17   : > { %v381_v31 = vunpack.c.l.b16 %v361_v23  ;;  %v382_v32 = vunpack.c.l.b16 %v362_v24  ;;  %v375_v33 = vunpack.c.l.b16 %v355_v25  ;;  %v376_v34 = vunpack.c.l.b16 %v356_v26  ;;  %v1078_v25 = vld [vmem:[%s1264_s16 + $0x18] sm:$0xff]  }
  0x18   : > { %v384_v35 = vpack.c.b16 %v378_v28, %v377_v27  ;;  %v379_v42 = vunpack.c.l.b16 %v359_v40  ;;  %v380_v43 = vunpack.c.l.b16 %v360_v41  ;;  %v1051_v13 = vunpack.c.l.bf16 %v1077_v12 }
  0x19   : > { %v386_v36 = vpack.c.b16 %v382_v32, %v381_v31  ;;  %v383_v37 = vpack.c.b16 %v376_v34, %v375_v33  ;;  %v1052_v14 = vunpack.c.h.bf16 %v1077_v12  ;;  %v1063_v18 = vunpack.c.l.bf16 %v1080_v16  ;;  %v1079_v31 = vld [vmem:[%s1264_s16 + $0x20] sm:$0xff]  }
  0x1a   : > { %984 = vmatmul.msk.bf16.vlgmr.msra.gmra.mxu2 %vm399_vm0, %v384_v35  ;;  %v385_v44 = vpack.c.b16 %v380_v43, %v379_v42  ;;  %v1064_v19 = vunpack.c.h.bf16 %v1080_v16  ;;  %v1067_v20 = vunpack.c.l.bf16 %v1081_v17  ;;  %v1068_v21 = vunpack.c.h.bf16 %v1081_v17 }
  0x1b   : > { %986 = vmatmul.msk.bf16.vlgmr.msra.gmra.mxu3 %vm399_vm0, %v386_v36  ;;  %983 = vmatmul.msk.bf16.vlgmr.msra.gmra.mxu0 %vm399_vm0, %v383_v37  ;;  %v1117_v15 = vpack.i.bf16 %v1052_v14, %v1051_v13  ;;  %v1055_v27 = vunpack.c.l.bf16 %v1078_v25  ;;  %v1056_v28 = vunpack.c.h.bf16 %v1078_v25  ;;  %v1059_v32 = vunpack.c.l.bf16 %v1079_v31 }
  0x1c   : > { %v1132_v22 = vpack.i.bf16 %v1064_v19, %v1063_v18  ;;  %v1137_v23 = vpack.i.bf16 %v1068_v21, %v1067_v20  ;;  %v1060_v33 = vunpack.c.h.bf16 %v1079_v31  ;;  %v1071_v42 = vunpack.c.l.bf16 %v1082_v39 }
  0x1d   : > { %v1122_v30 = vpack.i.bf16 %v1056_v28, %v1055_v27  ;;  %v1072_v43 = vunpack.c.h.bf16 %v1082_v39 }
  0x1e   : > { %v1127_v38 = vpack.i.bf16 %v1060_v33, %v1059_v32 }
  0x2a   : > { %985 = vmatmul.msk.bf16.gmra.mxu2 %vm399_vm0, %v385_v44 }
  0x98   : > { %v421_v45 = vpop.f32.mrf.mxu0 }
  0x99   : > { %v441_v58 = vpack.c.bf16 %v421_v45, %v421_v45 }
  0x9b   : > { %v451_v63 = vunpack.c.l.b16 %v441_v58 }
  0x9d   : > { %v426_v46 = vpop.f32.mrf.mxu2 }
  0x9e   : > { %v436_v47 = vpop.f32.mrf.mxu3  ;;  %v443_v48 = vpack.c.bf16 %v426_v46, %v426_v46 }
  0x9f   : > { %v447_v49 = vpack.c.bf16 %v436_v47, %v436_v47 }
  0xa0   : > { %v458_v51 = vunpack.c.l.b16 %v443_v48  ;;  %v423_v54 = vpop.f32.mrf.mxu0  ;;  %v1019_v48 = vld [vmem:[%s1415_s4] sm:$0xff] }
  0xa1   : > { %v472_v57 = vunpack.c.l.b16 %v447_v49  ;;  %v442_v60 = vpack.c.bf16 %v423_v54, %v423_v54  ;;  %v1142_v49 = vpack.i.bf16 %v1072_v43, %v1071_v42  ;;  %v1042_v42 = vld [vmem:[%s1264_s16] sm:$0xff]   ;;  %v1076_v43 = vld [vmem:[%s1264_s16 + $0x8] sm:$0xff]  }
  0xa3   : > { %v452_v0 = vunpack.c.l.b16 %v442_v60 }
  0xa5   : > { %v428_v50 = vpop.f32.mrf.mxu2  ;;  %v1249_v2 = vpack.c.b16 %v452_v0, %v451_v63 }
  0xa6   : > { %v444_v52 = vpack.c.bf16 %v428_v50, %v428_v50  ;;  %v438_v53 = vpop.f32.mrf.mxu3  ;;  %v1020_v50 = vld [vmem:[%s1415_s4 + $0x8] sm:$0xff] }
  0xa7   : > { %v448_v55 = vpack.c.bf16 %v438_v53, %v438_v53 }
  0xa8   : > { %v459_v56 = vunpack.c.l.b16 %v444_v52 }
  0xa9   : > { %v473_v59 = vunpack.c.l.b16 %v448_v55 }
  0xaa   : > { %v460_v61 = vpack.c.b16 %v459_v56, %v458_v51 }
  0xab   : > { %v474_v62 = vpack.c.b16 %v473_v59, %v472_v57 }
  0xac   : > { %461 = vrot.lane.b32.xlu0 %v460_v61, %s1171_s9 }
  0xad   : > { %475 = vrot.lane.b32.xlu1 %v474_v62, %s1171_s9  ;;  %v431_v1 = vpop.f32.mrf.mxu2 }
  0xae   : > { %v445_v3 = vpack.c.bf16 %v431_v1, %v431_v1 }
  0xb0   : > { %v465_v5 = vunpack.c.l.b16 %v445_v3 }
  0xb5   : > { %454 = vrot.lane.b32.xlu1 %v1249_v2, %s1171_s9  ;;  %v433_v4 = vpop.f32.mrf.mxu2 }
  0xb6   : > { %v446_v6 = vpack.c.bf16 %v433_v4, %v433_v4 }
  0xb8   : > { %v466_v7 = vunpack.c.l.b16 %v446_v6 }
  0xba   : > { %v467_v8 = vpack.c.b16 %v466_v7, %v465_v5 }
  0xbc   : > { %468 = vrot.lane.b32.xlu0 %v467_v8, %s1171_s9 }
  0xbd   : > { %477 = vrot.lane.b32.xlu1 %v460_v61, %s1172_s10 }
  0xc5   : > { %1118 = vrot.lane.b32.xlu1 %v1117_v15, %s1172_s10 }
  0xcd   : > { %1138 = vrot.lane.b32.xlu1 %v1137_v23, %s1173_s11 }
 0x11e   : > { %v462_v9 = vpop.permute.xlu0 %461 }
 0x11f   : > { %v476_v10 = vpop.permute.xlu1 %475  ;;  %479 = vrot.lane.b32.xlu2 %v462_v9, %s1172_s10 }
 0x120   : > { %487 = vrot.lane.b32.xlu0 %v476_v10, %s1173_s11 }
 0x127   : > { %v455_v26 = vpop.permute.xlu1 %454 }
 0x128   : > { %485 = vrot.lane.b32.xlu0 %v474_v62, %s1173_s11 }
 0x12e   : > { %v469_v11 = vpop.permute.xlu0 %468 }
 0x12f   : > { %483 = vrot.lane.b32.xlu2 %v469_v11, %s1174_s12  ;;  %v478_v40 = vpop.permute.xlu1 %477 }
 0x130   : > { %1133 = vrot.lane.b32.xlu0 %v1132_v22, %s1174_s12  ;;  %v492_v44 = vsel %vm489_vm1, %v1249_v2, %v478_v40 }
 0x137   : > { %481 = vrot.lane.b32.xlu2 %v467_v8, %s1174_s12  ;;  %v1119_v53 = vpop.permute.xlu1 %1118 }
 0x138   : > { %v1121_v54 = vunpack.i.h.bf16 %v1119_v53  ;;  %v1120_v63 = vunpack.i.l.bf16 %v1119_v53 }
 0x13f   : > { %1123 = vrot.lane.b32.xlu2 %v1122_v30, %s1172_s10  ;;  %v1139_v9 = vpop.permute.xlu1 %1138 }
 0x140   : > { %v1141_v14 = vunpack.i.h.bf16 %v1139_v9  ;;  %v1140_v15 = vunpack.i.l.bf16 %v1139_v9 }
 0x147   : > { %1128 = vrot.lane.b32.xlu2 %v1127_v38, %s1174_s12 }
 0x14f   : > { %1143 = vrot.lane.b32.xlu2 %v1142_v49, %s1173_s11 }
 0x179   : > { %v480_v24 = vpop.permute.xlu2 %479 }
 0x17a   : > { %v495_v34 = vsel %vm489_vm1, %v455_v26, %v480_v24 }
 0x189   : > { %v484_v29 = vpop.permute.xlu2 %483 }
 0x18a   : > { %v499_v35 = vsel %vm399_vm0, %v495_v34, %v484_v29 }
 0x191   : > { %v482_v41 = vpop.permute.xlu2 %481 }
 0x192   : > { %v488_v36 = vpop.permute.xlu0 %487  ;;  %v497_v45 = vsel %vm399_vm0, %v492_v44, %v482_v41  ;;  %v1043_v44 = vunpack.c.l.bf16 %v1042_v42 }
 0x193   : > { %v505_v37 = vsel %vm500_vm2, %v499_v35, %v488_v36 }
 0x194   : > { %533 = vmatpush.bf16.msra.mxu1 %v505_v37 }
 0x199   : > { %v1124_v51 = vpop.permute.xlu2 %1123 }
 0x19a   : > { %v486_v46 = vpop.permute.xlu0 %485  ;;  %v1126_v55 = vunpack.i.h.bf16 %v1124_v51  ;;  %v1125_v61 = vunpack.i.l.bf16 %v1124_v51 }
 0x19b   : > { %v502_v47 = vsel %vm500_vm2, %v497_v45, %v486_v46  ;;  %v1047_v45 = vunpack.c.l.bf16 %v1076_v43 }
 0x19c   : > { %534 = vmatpush.bf16.msra.mxu1 %v502_v47 }
 0x19f   : > { %995 = vmatmul.msk.bf16.vlgmr.msra.gmra.mxu1 %vm399_vm0, %v1019_v48 }
 0x1a1   : > { %v1295_v56 = vpop.permute.xlu2 %1128 }
 0x1a2   : > { %v1299_v58 = vpop.permute.xlu0 %1133  ;;  %v1130_v0 = vunpack.i.l.bf16 %v1295_v56  ;;  %v1131_v37 = vunpack.i.h.bf16 %v1295_v56  ;;  %v1048_v56 = vunpack.c.h.bf16 %v1076_v43 }
 0x1a3   : > { %v1135_v62 = vunpack.i.l.bf16 %v1299_v58  ;;  %v1136_v38 = vunpack.i.h.bf16 %v1299_v58 }
 0x1a9   : > { %v1144_v8 = vpop.permute.xlu2 %1143 }
 0x1aa   : > { %v1145_v13 = vunpack.i.l.bf16 %v1144_v8  ;;  %v1146_v16 = vunpack.i.h.bf16 %v1144_v8 }
 0x1af   : > { %996 = vmatmul.msk.bf16.gmra.mxu1 %vm399_vm0, %v1020_v50 }
 0x21c   : > { %v1293_v52 = vpop.f32.mrf.mxu1 }
 0x21d   : > { %v710_v2 = vmul.f32 %v1135_v62, %v1293_v52  ;;  %v631_v3 = vmul.f32 %v1125_v61, %v1293_v52  ;;  %v615_v6 = vmul.f32 %v1120_v63, %v1293_v52  ;;  %v773_v20 = vmul.f32 %v1140_v15, %v1293_v52 }
 0x21e   : > { %v694_v21 = vmul.f32 %v1130_v0, %v1293_v52  ;;  %v789_v35 = vmul.f32 %v1145_v13, %v1293_v52  ;;  %v555_v47 = vmul.f32 %v1043_v44, %v1293_v52  ;;  %v563_v51 = vmul.f32 %v1047_v45, %v1293_v52 }
 0x224   : > { %v1297_v57 = vpop.f32.mrf.mxu1 }
 0x225   : > { %v616_v59 = vmul.f32 %v1121_v54, %v1297_v57  ;;  %v1303_v60 = vmul.f32 %v1126_v55, %v1297_v57  ;;  %v774_v23 = vmul.f32 %v1141_v14, %v1297_v57  ;;  %v790_v27 = vmul.f32 %v1146_v16, %v1297_v57 }
 0x226   : > { %v695_v40 = vmul.f32 %v1131_v37, %v1297_v57 }
 0x22c   : > { %v541_v1 = vpop.f32.mrf.mxu1 }
 0x22d   : > { %v708_v4 = vmul.f32 %v1130_v0, %v541_v1  ;;  %v629_v5 = vmul.f32 %v1120_v63, %v541_v1  ;;  %v625_v7 = vmul.f32 %v1125_v61, %v541_v1  ;;  %v783_v17 = vmul.f32 %v1145_v13, %v541_v1 }
 0x22e   : > { %v704_v19 = vmul.f32 %v1135_v62, %v541_v1  ;;  %v787_v34 = vmul.f32 %v1140_v15, %v541_v1  ;;  %v557_v46 = vmul.f32 %v1047_v45, %v541_v1  ;;  %v561_v50 = vmul.f32 %v1043_v44, %v541_v1 }
 0x22f   : > { %v712_v10 = vsub.f32 %v708_v4, %v710_v2  ;;  %v633_v11 = vsub.f32 %v629_v5, %v631_v3  ;;  %v627_v12 = vadd.f32 %v625_v7, %v615_v6  ;;  %v785_v28 = vadd.f32 %v783_v17, %v773_v20 }
 0x230   : > { %v706_v30 = vadd.f32 %v704_v19, %v694_v21  ;;  %v791_v36 = vsub.f32 %v787_v34, %v789_v35  ;;  %v559_v48 = vadd.f32 %v557_v46, %v555_v47  ;;  %v565_v53 = vsub.f32 %v561_v50, %v563_v51 }
 0x231   : > { %730 = vrot.lane.b32.xlu2 %v712_v10, %s1175_s25  ;;  %651 = vrot.lane.b32.xlu1 %v633_v11, %s1171_s9  ;;  %v564_v63 = vmul.f32 %v1048_v56, %v1297_v57  ;;  %v711_v2 = vmul.f32 %v1136_v38, %v1297_v57 }
 0x232   : > { %637 = vrot.lane.b32.xlu0 %v627_v12, %s1171_s9  ;;  %v567_v49 = vsel %vm489_vm1, %v559_v48, 0.0 }
 0x234   : > { %v543_v18 = vpop.f32.mrf.mxu1 }
 0x235   : > { %v626_v22 = vmul.f32 %v1126_v55, %v543_v18  ;;  %v630_v24 = vmul.f32 %v1121_v54, %v543_v18  ;;  %v784_v25 = vmul.f32 %v1146_v16, %v543_v18  ;;  %v788_v26 = vmul.f32 %v1141_v14, %v543_v18 }
 0x236   : > { %v705_v39 = vmul.f32 %v1136_v38, %v543_v18  ;;  %v573_v54 = vsel %vm489_vm1, %v565_v53, 0.0  ;;  %v1044_v55 = vunpack.c.h.bf16 %v1042_v42  ;;  %v558_v58 = vmul.f32 %v1048_v56, %v543_v18 }
 0x237   : > { %v628_v29 = vadd.f32 %v626_v22, %v616_v59  ;;  %v634_v31 = vsub.f32 %v630_v24, %v1303_v60  ;;  %v786_v32 = vadd.f32 %v784_v25, %v774_v23  ;;  %v792_v33 = vsub.f32 %v788_v26, %v790_v27 }
 0x238   : > { %v707_v41 = vadd.f32 %v705_v39, %v695_v40  ;;  %v556_v59 = vmul.f32 %v1044_v55, %v1297_v57  ;;  %v562_v62 = vmul.f32 %v1044_v55, %v543_v18  ;;  %v709_v1 = vmul.f32 %v1131_v37, %v543_v18 }
 0x239   : > { %795 = vrot.lane.b32.xlu2 %v785_v28, %s1176_s26  ;;  %v581_v16 = vlaneseq }
 0x23a   : > { %716 = vrot.lane.b32.xlu0 %v706_v30, %s1175_s25  ;;  %v560_v60 = vadd.f32 %v558_v58, %v556_v59  ;;  %v566_v0 = vsub.f32 %v562_v62, %v564_v63  ;;  %v713_v3 = vsub.f32 %v709_v1, %v711_v2 }
 0x23b   : > { %v1347_v18 = vand.u32 127, %v581_v16 }
 0x23c   : > { %v570_v61 = vsel %vm489_vm1, %v560_v60, 0.0  ;;  %v576_v52 = vsel %vm489_vm1, %v566_v0, 0.0 }
 0x23d   : > { %v1351_v21 = vadd.s32 4294967288, %v1347_v18 }
 0x241   : > { %809 = vrot.lane.b32.xlu2 %v791_v36, %s1176_s26 }
 0x249   : > { %718 = vrot.lane.b32.xlu2 %v707_v41, %s1175_s25 }
 0x25b   : > { %568 = vadd.xlane.f32.xlu1 %v567_v49 }
 0x264   : > { %574 = vadd.xlane.f32.xlu0 %v573_v54 }
 0x272   : > { %571 = vadd.xlane.f32.xlu2 %v570_v61 }
 0x274   : > { %639 = vrot.lane.b32.xlu1 %v628_v29, %s1171_s9 }
 0x27a   : > { %577 = vadd.xlane.f32.xlu2 %v576_v52 }
 0x27c   : > { %653 = vrot.lane.b32.xlu1 %v634_v31, %s1171_s9 }
 0x284   : > { %732 = vrot.lane.b32.xlu1 %v713_v3, %s1175_s25 }
 0x28b   : > { %v731_v6 = vpop.permute.xlu2 %730 }
 0x28c   : > { %797 = vrot.lane.b32.xlu1 %v786_v32, %s1176_s26  ;;  %v736_v12 = vsel %vm489_vm1, %v731_v6, 0.0 }
 0x293   : > { %v796_v9 = vpop.permute.xlu2 %795 }
 0x294   : > { %811 = vrot.lane.b32.xlu1 %v792_v33, %s1176_s26  ;;  %v801_v10 = vsel %vm489_vm1, %v796_v9, 0.0 }
 0x29b   : > { %v810_v13 = vpop.permute.xlu2 %809 }
 0x29c   : > { %v815_v40 = vsel %vm489_vm1, %v810_v13, 0.0 }
 0x2a3   : > { %v652_v57 = vpop.permute.xlu1 %651  ;;  %v719_v14 = vpop.permute.xlu2 %718 }
 0x2a4   : > { %v638_v4 = vpop.permute.xlu0 %637  ;;  %v657_v11 = vsel %vm489_vm1, %v652_v57, 0.0  ;;  %v725_v29 = vsel %vm489_vm1, %v719_v14, 0.0 }
 0x2a5   : > { %v643_v5 = vsel %vm489_vm1, %v638_v4, 0.0 }
 0x2a6   : > { %644 = vadd.xlane.f32.xlu0 %v643_v5 }
 0x2ac   : > { %v717_v7 = vpop.permute.xlu0 %716 }
 0x2ad   : > { %v722_v8 = vsel %vm489_vm1, %v717_v7, 0.0 }
 0x2ae   : > { %723 = vadd.xlane.f32.xlu0 %v722_v8 }
 0x2b6   : > { %802 = vadd.xlane.f32.xlu0 %v801_v10 }
 0x2be   : > { %658 = vadd.xlane.f32.xlu1 %v657_v11 }
 0x2c6   : > { %737 = vadd.xlane.f32.xlu1 %v736_v12 }
 0x2ce   : > { %v569_v15 = vpop.xlane.xlu1 %568 }
 0x2cf   : > { %v583_v25 = vperm.slane %v569_v15, %v1347_v18 }
 0x2d7   : > { %v575_v22 = vpop.xlane.xlu0 %574 }
 0x2d8   : > { %v591_v26 = vperm.slane %v575_v22, %v1347_v18 }
 0x2e5   : > { %v572_v17 = vpop.xlane.xlu2 %571 }
 0x2e6   : > { %v640_v19 = vpop.permute.xlu1 %639  ;;  %v585_v23 = vperm.slane %v572_v17, %v1351_v21 }
 0x2e7   : > { %v646_v20 = vsel %vm489_vm1, %v640_v19, 0.0 }
 0x2e8   : > { %647 = vadd.xlane.f32.xlu2 %v646_v20  ;;  %v587_v31 = vsel %vm586_vm3, %v585_v23, %v583_v25 }
 0x2ed   : > { %v578_v24 = vpop.xlane.xlu2 %577 }
 0x2ee   : > { %v592_v27 = vperm.slane %v578_v24, %v1351_v21  ;;  %v654_v28 = vpop.permute.xlu1 %653 }
 0x2ef   : > { %v660_v30 = vsel %vm489_vm1, %v654_v28, 0.0 }
 0x2f0   : > { %v593_v32 = vsel %vm586_vm3, %v592_v27, %v591_v26  ;;  %726 = vadd.xlane.f32.xlu2 %v725_v29  ;;  %661 = vadd.xlane.f32.xlu0 %v660_v30 }
 0x2f1   : > { %v596_v33 = vsel %vm595_vm4, %v587_v31, %v593_v32 }
 0x2f2   : > { %835 = vst.msk [vmem:[%s1362_s30] sm:$0x3] %vm834_vm5, %v596_v33 }
 0x2f6   : > { %v733_v34 = vpop.permute.xlu1 %732 }
 0x2f7   : > { %v739_v35 = vsel %vm489_vm1, %v733_v34, 0.0 }
 0x2f8   : > { %740 = vadd.xlane.f32.xlu0 %v739_v35 }
 0x2fe   : > { %v798_v36 = vpop.permute.xlu1 %797 }
 0x2ff   : > { %v804_v37 = vsel %vm489_vm1, %v798_v36, 0.0 }
 0x300   : > { %805 = vadd.xlane.f32.xlu0 %v804_v37 }
 0x306   : > { %v812_v38 = vpop.permute.xlu1 %811 }
 0x307   : > { %v818_v39 = vsel %vm489_vm1, %v812_v38, 0.0 }
 0x308   : > { %819 = vadd.xlane.f32.xlu2 %v818_v39  ;;  %816 = vadd.xlane.f32.xlu0 %v815_v40 }
 0x319   : > { %v645_v41 = vpop.xlane.xlu0 %644 }
 0x31a   : > { %v665_v48 = vperm.slane %v645_v41, %v1347_v18 }
 0x321   : > { %v724_v42 = vpop.xlane.xlu0 %723 }
 0x322   : > { %v744_v60 = vperm.slane %v724_v42, %v1347_v18 }
 0x329   : > { %v803_v43 = vpop.xlane.xlu0 %802 }
 0x32a   : > { %v823_v5 = vperm.slane %v803_v43, %v1347_v18 }
 0x331   : > { %v659_v45 = vpop.xlane.xlu1 %658 }
 0x332   : > { %v671_v49 = vperm.slane %v659_v45, %v1347_v18 }
 0x339   : > { %v738_v56 = vpop.xlane.xlu1 %737 }
 0x33a   : > { %v750_v61 = vperm.slane %v738_v56, %v1347_v18 }
 0x35b   : > { %v648_v44 = vpop.xlane.xlu2 %647 }
 0x35c   : > { %v666_v46 = vperm.slane %v648_v44, %v1351_v21 }
 0x35e   : > { %v667_v51 = vsel %vm586_vm3, %v666_v46, %v665_v48 }
 0x363   : > { %v662_v47 = vpop.xlane.xlu0 %661  ;;  %v727_v54 = vpop.xlane.xlu2 %726 }
 0x364   : > { %v672_v50 = vperm.slane %v662_v47, %v1351_v21  ;;  %v745_v58 = vperm.slane %v727_v54, %v1351_v21 }
 0x366   : > { %v673_v53 = vsel %vm586_vm3, %v672_v50, %v671_v49  ;;  %v746_v63 = vsel %vm586_vm3, %v745_v58, %v744_v60 }
 0x367   : > { %v675_v55 = vsel %vm595_vm4, %v667_v51, %v673_v53 }
 0x368   : > { %836 = vst.msk [vmem:[%s1362_s30 + $0x2] sm:$0x3] %vm834_vm5, %v675_v55 }
 0x36b   : > { %v741_v59 = vpop.xlane.xlu0 %740 }
 0x36c   : > { %v751_v62 = vperm.slane %v741_v59, %v1351_v21 }
 0x36e   : > { %v752_v0 = vsel %vm586_vm3, %v751_v62, %v750_v61 }
 0x36f   : > { %v754_v52 = vsel %vm595_vm4, %v746_v63, %v752_v0 }
 0x370   : > { %837 = vst.msk [vmem:[%s1362_s30 + $0x4] sm:$0x3] %vm834_vm5, %v754_v52 }
 0x373   : > { %v806_v1 = vpop.xlane.xlu0 %805 }
 0x374   : > { %v824_v2 = vperm.slane %v806_v1, %v1351_v21 }
 0x376   : > { %v825_v8 = vsel %vm586_vm3, %v824_v2, %v823_v5 }
 0x37b   : > { %v820_v3 = vpop.xlane.xlu2 %819  ;;  %v817_v4 = vpop.xlane.xlu0 %816 }
 0x37c   : > { %v830_v6 = vperm.slane %v820_v3, %v1351_v21  ;;  %v829_v7 = vperm.slane %v817_v4, %v1347_v18 }
 0x37e   : > { %v831_v9 = vsel %vm586_vm3, %v830_v6, %v829_v7 }
 0x37f   : > { %v833_v10 = vsel %vm595_vm4, %v825_v8, %v831_v9 }
 0x380   : > { %838 = vst.msk [vmem:[%s1362_s30 + $0x6] sm:$0x3] %vm834_vm5, %v833_v10 }
 0x381 PF: > { %s15_s20 = sadd.s32 1, %s1169_s20   ;;  %s1417_s18 = smov %s1165_s19 }
 0x382   : > { %p12_p5 = scmp.ge.s32.totalorder %s15_s20, 4   ;;  %s1418_s19 = smov %s1420_s21 }
 0x384   :  { %14 = sbr.rel (!%p12_p5) target bundleno = 2 (0x2), region = 83 }

</bundles_post_ra>
